<compile_context>
chip_gen: v7x
topology: tpu7x:2x2x1
jax: 0.10.0
libtpu: 0.0.40
codegen_flags: <defaults>
</compile_context>

<pallas_src>
import jax
import jax.numpy as jnp
from jax.experimental import pallas as pl
from jax.experimental.pallas import tpu as pltpu

BN_EPS = 1e-5
MAX_TILE_B = 512   # largest batch tile (multiple of 8); re-derived per call for small batches


def _round_up(x, m):
    return ((x + m - 1) // m) * m


# ----------------------------------------------------------------------------
# Pallas kernel: matmul + bias + ReLU x5, final matmul + bias -> (B, 2)
# ----------------------------------------------------------------------------
def regressor_kernel(x_ref, w1_ref, w2_ref, w3_ref, wh1_ref, wh2_ref, wh3_ref,
                     b_ref, o_ref):
    def linear(h, w_ref, row):
        # bf16 x bf16 on the MXU, f32 accumulation; bias add / ReLU stay f32.
        b = b_ref[row:row + 1, 0:w_ref.shape[1]]
        return jnp.dot(h.astype(jnp.bfloat16), w_ref[...],
                       preferred_element_type=jnp.float32) + b

    def relu(h):
        return jnp.maximum(h, 0.0)

    x = x_ref[...]
    # feature_extractor (BatchNorm already folded into W / b host-side; Dropout = identity)
    h = relu(linear(x, w1_ref, 0))
    h = relu(linear(h, w2_ref, 1))
    feat = relu(linear(h, w3_ref, 2))
    # fused L_ecran / gap heads (block-diagonal weights); final matmul -> (B, 2) directly
    h = relu(linear(feat, wh1_ref, 3))
    h = relu(linear(h, wh2_ref, 4))
    o_ref[...] = linear(h, wh3_ref, 5)


# ----------------------------------------------------------------------------
# Parameter construction (deterministic, mirrors _initialize_weights)
# Weights stored transposed vs PyTorch: (in_features, out_features).
# ----------------------------------------------------------------------------
def init_params(key, input_dim=1000, pca_components=10):
    dims_fe = [(input_dim, 256), (256, 64), (64, pca_components)]
    dims_head = [(pca_components, 32), (32, 16), (16, 1)]

    def kaiming_linear(k, fan_in, fan_out):
        # kaiming_normal_(mode='fan_in', nonlinearity='relu'): std = sqrt(2 / fan_in)
        std = jnp.sqrt(2.0 / fan_in)
        w = jax.random.normal(k, (fan_in, fan_out), dtype=jnp.float32) * std
        b = jnp.zeros((1, fan_out), dtype=jnp.float32)
        return w, b

    def bn_params(c):
        # rows: gamma=1, beta=0, running_mean=0, running_var=1 (fresh nn.BatchNorm1d)
        return jnp.stack([jnp.ones((c,), jnp.float32),
                          jnp.zeros((c,), jnp.float32),
                          jnp.zeros((c,), jnp.float32),
                          jnp.ones((c,), jnp.float32)], axis=0)

    keys = jax.random.split(key, 9)
    params = []
    ki = 0
    for (fi, fo) in dims_fe:            # feature extractor: (W, b, BN) x3
        w, b = kaiming_linear(keys[ki], fi, fo); ki += 1
        params += [w, b, bn_params(fo)]
    for (fi, fo) in dims_head:          # L_ecran head: (W, b) x3
        w, b = kaiming_linear(keys[ki], fi, fo); ki += 1
        params += [w, b]
    for (fi, fo) in dims_head:          # gap head: (W, b) x3
        w, b = kaiming_linear(keys[ki], fi, fo); ki += 1
        params += [w, b]
    return params


# ----------------------------------------------------------------------------
# Host-side prep: fold BN, fuse heads, pad dims, pack biases, cast to bf16
# ----------------------------------------------------------------------------
def prepare_params(params, input_dim, pca_components):
    (w1, b1, bn1, w2, b2, bn2, w3, b3, bn3,
     wl1, bl1, wl2, bl2, wl3, bl3,
     wg1, bg1, wg2, bg2, wg3, bg3) = params

    def fold_bn(w, b, bn):
        gamma, beta, rmean, rvar = bn[0], bn[1], bn[2], bn[3]
        scale = gamma * jax.lax.rsqrt(rvar + BN_EPS)
        return w * scale[None, :], (b - rmean[None, :]) * scale[None, :] + beta[None, :]

    def block_diag(a, c):
        top = jnp.concatenate([a, jnp.zeros((a.shape[0], c.shape[1]), a.dtype)], axis=1)
        bot = jnp.concatenate([jnp.zeros((c.shape[0], a.shape[1]), a.dtype), c], axis=1)
        return jnp.concatenate([top, bot], axis=0)

    w1f, b1f = fold_bn(w1, b1, bn1)
    w2f, b2f = fold_bn(w2, b2, bn2)
    w3f, b3f = fold_bn(w3, b3, bn3)

    # pad contraction / feature dims to aligned sizes (exactness preserved: zero pads)
    d_in_pad = _round_up(input_dim, 128)        # 1000 -> 1024
    pca_pad = _round_up(pca_components, 8)      # 10 -> 16
    w1f = jnp.pad(w1f, ((0, d_in_pad - input_dim), (0, 0)))
    w3f = jnp.pad(w3f, ((0, 0), (0, pca_pad - pca_components)))

    # fuse the two heads
    wh1 = jnp.concatenate([wl1, wg1], axis=1)                        # (pca, 64)
    wh1 = jnp.pad(wh1, ((0, pca_pad - pca_components), (0, 0)))      # (pca_pad, 64)
    bh1 = jnp.concatenate([bl1, bg1], axis=1)                        # (1, 64)
    wh2 = block_diag(wl2, wg2)                                       # (64, 32)
    bh2 = jnp.concatenate([bl2, bg2], axis=1)                        # (1, 32)
    wh3 = block_diag(wl3, wg3)                                       # (32, 2)
    bh3 = jnp.concatenate([bl3, bg3], axis=1)                        # (1, 2)

    # pack all biases into one (8, 256) f32 slab; rows 0..5 used, rest zero
    packed = jnp.zeros((8, 256), jnp.float32)
    for i, b in enumerate([b1f, b2f, b3f, bh1, bh2, bh3]):
        packed = packed.at[i, :b.shape[1]].set(b[0])

    weights = tuple(w.astype(jnp.bfloat16) for w in (w1f, w2f, w3f, wh1, wh2, wh3))
    return weights + (packed,)


# ----------------------------------------------------------------------------
# Wrapper around pallas_call (batch grid, weights resident, output direct)
# ----------------------------------------------------------------------------
@jax.jit
def simple_effective_regressor(x, w1, w2, w3, wh1, wh2, wh3, biases):
    batch, d_in = x.shape
    d_pad = w1.shape[0]
    tile_b = min(MAX_TILE_B, _round_up(batch, 8))
    b_pad = _round_up(batch, tile_b)
    x = jnp.pad(x, ((0, b_pad - batch), (0, d_pad - d_in)))

    out = pl.pallas_call(
        regressor_kernel,
        out_shape=jax.ShapeDtypeStruct((b_pad, 2), jnp.float32),
        grid=(b_pad // tile_b,),
        in_specs=[
            pl.BlockSpec((tile_b, d_pad), lambda i: (i, 0)),   # x: pipelined batch tiles
            pl.BlockSpec(w1.shape, lambda i: (0, 0)),          # weights stay VMEM-resident
            pl.BlockSpec(w2.shape, lambda i: (0, 0)),
            pl.BlockSpec(w3.shape, lambda i: (0, 0)),
            pl.BlockSpec(wh1.shape, lambda i: (0, 0)),
            pl.BlockSpec(wh2.shape, lambda i: (0, 0)),
            pl.BlockSpec(wh3.shape, lambda i: (0, 0)),
            pl.BlockSpec(biases.shape, lambda i: (0, 0)),      # packed bias slab
        ],
        out_specs=pl.BlockSpec((tile_b, 2), lambda i: (i, 0)),
        compiler_params=pltpu.CompilerParams(
            dimension_semantics=("parallel",)),
    )(x, w1, w2, w3, wh1, wh2, wh3, biases)
    return out[:batch]


# ----------------------------------------------------------------------------
# References
# ----------------------------------------------------------------------------
def reference_forward(x, params):
    """Original module semantics (f32, explicit eval-BN, separate heads)."""
    (w1, b1, bn1, w2, b2, bn2, w3, b3, bn3,
     wl1, bl1, wl2, bl2, wl3, bl3,
     wg1, bg1, wg2, bg2, wg3, bg3) = params

    def bn(h, p):
        return (h - p[2]) * jax.lax.rsqrt(p[3] + BN_EPS) * p[0] + p[1]

    h = jax.nn.relu(bn(x @ w1 + b1, bn1))
    h = jax.nn.relu(bn(h @ w2 + b2, bn2))
    f = jax.nn.relu(bn(h @ w3 + b3, bn3))
    l = jax.nn.relu(f @ wl1 + bl1)
    l = jax.nn.relu(l @ wl2 + bl2)
    l = l @ wl3 + bl3
    g = jax.nn.relu(f @ wg1 + bg1)
    g = jax.nn.relu(g @ wg2 + bg2)
    g = g @ wg3 + bg3
    return jnp.concatenate([l, g], axis=1)


def reference_prepared(x, prepared):
    """Pure-JAX mirror of the exact kernel math path (folded/fused/bf16)."""
    w1, w2, w3, wh1, wh2, wh3, biases = prepared
    x = jnp.pad(x, ((0, 0), (0, w1.shape[0] - x.shape[1])))

    def lin(h, w, row):
        b = biases[row:row + 1, :w.shape[1]]
        return jnp.dot(h.astype(jnp.bfloat16), w,
                       preferred_element_type=jnp.float32) + b

    h = jax.nn.relu(lin(x, w1, 0))
    h = jax.nn.relu(lin(h, w2, 1))
    f = jax.nn.relu(lin(h, w3, 2))
    h = jax.nn.relu(lin(f, wh1, 3))
    h = jax.nn.relu(lin(h, wh2, 4))
    return lin(h, wh3, 5)


if __name__ == "__main__":
    key = jax.random.PRNGKey(0)
    k_x, k_p = jax.random.split(key)

    batch = 8
    input_dim = 1000          # SimpleEffectiveRegressor default
    pca_components = 10

    x = jax.random.normal(k_x, (batch, input_dim), dtype=jnp.float32)
    params = init_params(k_p, input_dim=input_dim, pca_components=pca_components)
    prepared = prepare_params(params, input_dim, pca_components)

    out = simple_effective_regressor(x, *prepared)
    out = jax.block_until_ready(out)
    assert out.shape == (batch, 2), out.shape

    # tight check vs. a pure-JAX mirror of the exact kernel math path
    ref_p = reference_prepared(x, prepared)
    assert jnp.allclose(out, ref_p, atol=2e-3, rtol=2e-3), (
        "mismatch vs prepared reference: max abs diff = "
        f"{jnp.max(jnp.abs(out - ref_p))}")

    # looser semantic check vs. the original f32 module math (bf16 weights in kernel)
    ref = reference_forward(x, params)
    assert jnp.allclose(out, ref, atol=1e-1, rtol=5e-2), (
        "mismatch vs f32 module reference: max abs diff = "
        f"{jnp.max(jnp.abs(out - ref))}")

    print("KERNEL_OK")
</pallas_src>

<mosaic_0001>
module attributes {stable_mosaic.version = 11 : i64} {
  func.func @regressor_kernel(%arg0: i32, %arg1: memref<8x1024xf32, #tpu.memory_space<vmem>>, %arg2: memref<1024x256xbf16, #tpu.memory_space<vmem>>, %arg3: memref<256x64xbf16, #tpu.memory_space<vmem>>, %arg4: memref<64x16xbf16, #tpu.memory_space<vmem>>, %arg5: memref<16x64xbf16, #tpu.memory_space<vmem>>, %arg6: memref<64x32xbf16, #tpu.memory_space<vmem>>, %arg7: memref<32x2xbf16, #tpu.memory_space<vmem>>, %arg8: memref<8x256xf32, #tpu.memory_space<vmem>>, %arg9: memref<8x2xf32, #tpu.memory_space<vmem>>) attributes {dimension_semantics = [#tpu.dimension_semantics<parallel>], iteration_bounds = array<i64: 1>, scalar_prefetch = 0 : i64, scratch_operands = 0 : i64, tpu.core_type = #tpu.core_type<tc>, window_params = [{transform_indices = @transform_0, window_bounds = array<i64: 8, 1024>}, {pipeline_mode = #tpu.pipeline_mode<synchronous>, transform_indices = @transform_1, window_bounds = array<i64: 1024, 256>}, {pipeline_mode = #tpu.pipeline_mode<synchronous>, transform_indices = @transform_2, window_bounds = array<i64: 256, 64>}, {pipeline_mode = #tpu.pipeline_mode<synchronous>, transform_indices = @transform_3, window_bounds = array<i64: 64, 16>}, {pipeline_mode = #tpu.pipeline_mode<synchronous>, transform_indices = @transform_4, window_bounds = array<i64: 16, 64>}, {pipeline_mode = #tpu.pipeline_mode<synchronous>, transform_indices = @transform_5, window_bounds = array<i64: 64, 32>}, {pipeline_mode = #tpu.pipeline_mode<synchronous>, transform_indices = @transform_6, window_bounds = array<i64: 32, 2>}, {pipeline_mode = #tpu.pipeline_mode<synchronous>, transform_indices = @transform_7, window_bounds = array<i64: 8, 256>}, {transform_indices = @transform_8, window_bounds = array<i64: 8, 2>}]} {
    %c0 = arith.constant 0 : index
    %c0_0 = arith.constant 0 : index
    %0 = vector.load %arg1[%c0, %c0_0] : memref<8x1024xf32, #tpu.memory_space<vmem>>, vector<8x1024xf32>
    %c0_1 = arith.constant 0 : index
    %c0_2 = arith.constant 0 : index
    %1 = vector.load %arg8[%c0_1, %c0_2] : memref<8x256xf32, #tpu.memory_space<vmem>>, vector<1x256xf32>
    %2 = arith.truncf %0 : vector<8x1024xf32> to vector<8x1024xbf16>
    %c0_3 = arith.constant 0 : index
    %c0_4 = arith.constant 0 : index
    %3 = vector.load %arg2[%c0_3, %c0_4] : memref<1024x256xbf16, #tpu.memory_space<vmem>>, vector<1024x256xbf16>
    %cst = arith.constant dense<0.000000e+00> : vector<8x256xf32>
    %4 = tpu.matmul %2, %3, %cst {dimension_numbers = #tpu.dot_dimension_numbers<[1], [0], [0], [1], [0, 0, 1, 1], [], []>} : vector<8x1024xbf16>, vector<1024x256xbf16>, vector<8x256xf32> -> vector<8x256xf32>
    %5 = vector.broadcast %1 : vector<1x256xf32> to vector<8x256xf32>
    %6 = arith.addf %4, %5 : vector<8x256xf32>
    %cst_5 = arith.constant 0.000000e+00 : f32
    %7 = vector.broadcast %cst_5 : f32 to vector<8x256xf32>
    %8 = arith.maximumf %6, %7 : vector<8x256xf32>
    %c1 = arith.constant 1 : index
    %c0_6 = arith.constant 0 : index
    %9 = vector.load %arg8[%c1, %c0_6] : memref<8x256xf32, #tpu.memory_space<vmem>>, vector<1x64xf32>
    %10 = arith.truncf %8 : vector<8x256xf32> to vector<8x256xbf16>
    %c0_7 = arith.constant 0 : index
    %c0_8 = arith.constant 0 : index
    %11 = vector.load %arg3[%c0_7, %c0_8] : memref<256x64xbf16, #tpu.memory_space<vmem>>, vector<256x64xbf16>
    %cst_9 = arith.constant dense<0.000000e+00> : vector<8x64xf32>
    %12 = tpu.matmul %10, %11, %cst_9 {dimension_numbers = #tpu.dot_dimension_numbers<[1], [0], [0], [1], [0, 0, 1, 1], [], []>} : vector<8x256xbf16>, vector<256x64xbf16>, vector<8x64xf32> -> vector<8x64xf32>
    %13 = vector.broadcast %9 : vector<1x64xf32> to vector<8x64xf32>
    %14 = arith.addf %12, %13 : vector<8x64xf32>
    %cst_10 = arith.constant 0.000000e+00 : f32
    %15 = vector.broadcast %cst_10 : f32 to vector<8x64xf32>
    %16 = arith.maximumf %14, %15 : vector<8x64xf32>
    %c2 = arith.constant 2 : index
    %c0_11 = arith.constant 0 : index
    %17 = vector.load %arg8[%c2, %c0_11] : memref<8x256xf32, #tpu.memory_space<vmem>>, vector<1x16xf32>
    %18 = arith.truncf %16 : vector<8x64xf32> to vector<8x64xbf16>
    %c0_12 = arith.constant 0 : index
    %c0_13 = arith.constant 0 : index
    %19 = vector.load %arg4[%c0_12, %c0_13] : memref<64x16xbf16, #tpu.memory_space<vmem>>, vector<64x16xbf16>
    %cst_14 = arith.constant dense<0.000000e+00> : vector<8x16xf32>
    %20 = tpu.matmul %18, %19, %cst_14 {dimension_numbers = #tpu.dot_dimension_numbers<[1], [0], [0], [1], [0, 0, 1, 1], [], []>} : vector<8x64xbf16>, vector<64x16xbf16>, vector<8x16xf32> -> vector<8x16xf32>
    %21 = vector.broadcast %17 : vector<1x16xf32> to vector<8x16xf32>
    %22 = arith.addf %20, %21 : vector<8x16xf32>
    %cst_15 = arith.constant 0.000000e+00 : f32
    %23 = vector.broadcast %cst_15 : f32 to vector<8x16xf32>
    %24 = arith.maximumf %22, %23 : vector<8x16xf32>
    %c3 = arith.constant 3 : index
    %c0_16 = arith.constant 0 : index
    %25 = vector.load %arg8[%c3, %c0_16] : memref<8x256xf32, #tpu.memory_space<vmem>>, vector<1x64xf32>
    %26 = arith.truncf %24 : vector<8x16xf32> to vector<8x16xbf16>
    %c0_17 = arith.constant 0 : index
    %c0_18 = arith.constant 0 : index
    %27 = vector.load %arg5[%c0_17, %c0_18] : memref<16x64xbf16, #tpu.memory_space<vmem>>, vector<16x64xbf16>
    %cst_19 = arith.constant dense<0.000000e+00> : vector<8x64xf32>
    %28 = tpu.matmul %26, %27, %cst_19 {dimension_numbers = #tpu.dot_dimension_numbers<[1], [0], [0], [1], [0, 0, 1, 1], [], []>} : vector<8x16xbf16>, vector<16x64xbf16>, vector<8x64xf32> -> vector<8x64xf32>
    %29 = vector.broadcast %25 : vector<1x64xf32> to vector<8x64xf32>
    %30 = arith.addf %28, %29 : vector<8x64xf32>
    %cst_20 = arith.constant 0.000000e+00 : f32
    %31 = vector.broadcast %cst_20 : f32 to vector<8x64xf32>
    %32 = arith.maximumf %30, %31 : vector<8x64xf32>
    %c4 = arith.constant 4 : index
    %c0_21 = arith.constant 0 : index
    %33 = vector.load %arg8[%c4, %c0_21] : memref<8x256xf32, #tpu.memory_space<vmem>>, vector<1x32xf32>
    %34 = arith.truncf %32 : vector<8x64xf32> to vector<8x64xbf16>
    %c0_22 = arith.constant 0 : index
    %c0_23 = arith.constant 0 : index
    %35 = vector.load %arg6[%c0_22, %c0_23] : memref<64x32xbf16, #tpu.memory_space<vmem>>, vector<64x32xbf16>
    %cst_24 = arith.constant dense<0.000000e+00> : vector<8x32xf32>
    %36 = tpu.matmul %34, %35, %cst_24 {dimension_numbers = #tpu.dot_dimension_numbers<[1], [0], [0], [1], [0, 0, 1, 1], [], []>} : vector<8x64xbf16>, vector<64x32xbf16>, vector<8x32xf32> -> vector<8x32xf32>
    %37 = vector.broadcast %33 : vector<1x32xf32> to vector<8x32xf32>
    %38 = arith.addf %36, %37 : vector<8x32xf32>
    %cst_25 = arith.constant 0.000000e+00 : f32
    %39 = vector.broadcast %cst_25 : f32 to vector<8x32xf32>
    %40 = arith.maximumf %38, %39 : vector<8x32xf32>
    %c5 = arith.constant 5 : index
    %c0_26 = arith.constant 0 : index
    %41 = vector.load %arg8[%c5, %c0_26] : memref<8x256xf32, #tpu.memory_space<vmem>>, vector<1x2xf32>
    %42 = arith.truncf %40 : vector<8x32xf32> to vector<8x32xbf16>
    %c0_27 = arith.constant 0 : index
    %c0_28 = arith.constant 0 : index
    %43 = vector.load %arg7[%c0_27, %c0_28] : memref<32x2xbf16, #tpu.memory_space<vmem>>, vector<32x2xbf16>
    %cst_29 = arith.constant dense<0.000000e+00> : vector<8x2xf32>
    %44 = tpu.matmul %42, %43, %cst_29 {dimension_numbers = #tpu.dot_dimension_numbers<[1], [0], [0], [1], [0, 0, 1, 1], [], []>} : vector<8x32xbf16>, vector<32x2xbf16>, vector<8x2xf32> -> vector<8x2xf32>
    %45 = vector.broadcast %41 : vector<1x2xf32> to vector<8x2xf32>
    %46 = arith.addf %44, %45 : vector<8x2xf32>
    %c0_30 = arith.constant 0 : index
    %c0_31 = arith.constant 0 : index
    %47 = vector.load %arg9[%c0_30, %c0_31] : memref<8x2xf32, #tpu.memory_space<vmem>>, vector<8x2xf32>
    tpu.vector_store %arg9[%c0_30, %c0_31], %46 {strides = array<i32>} : memref<8x2xf32, #tpu.memory_space<vmem>>, vector<8x2xf32>,
    return
  }
  func.func @transform_0(%arg0: i32) -> (i32, i32) {
    %c0_i32 = arith.constant 0 : i32
    %c0_i32_0 = arith.constant 0 : i32
    return %arg0, %c0_i32 : i32, i32
  }
  func.func @transform_1(%arg0: i32) -> (i32, i32) {
    %c0_i32 = arith.constant 0 : i32
    %c0_i32_0 = arith.constant 0 : i32
    %c0_i32_1 = arith.constant 0 : i32
    return %c0_i32, %c0_i32_0 : i32, i32
  }
  func.func @transform_2(%arg0: i32) -> (i32, i32) {
    %c0_i32 = arith.constant 0 : i32
    %c0_i32_0 = arith.constant 0 : i32
    %c0_i32_1 = arith.constant 0 : i32
    return %c0_i32, %c0_i32_0 : i32, i32
  }
  func.func @transform_3(%arg0: i32) -> (i32, i32) {
    %c0_i32 = arith.constant 0 : i32
    %c0_i32_0 = arith.constant 0 : i32
    %c0_i32_1 = arith.constant 0 : i32
    return %c0_i32, %c0_i32_0 : i32, i32
  }
  func.func @transform_4(%arg0: i32) -> (i32, i32) {
    %c0_i32 = arith.constant 0 : i32
    %c0_i32_0 = arith.constant 0 : i32
    %c0_i32_1 = arith.constant 0 : i32
    return %c0_i32, %c0_i32_0 : i32, i32
  }
  func.func @transform_5(%arg0: i32) -> (i32, i32) {
    %c0_i32 = arith.constant 0 : i32
    %c0_i32_0 = arith.constant 0 : i32
    %c0_i32_1 = arith.constant 0 : i32
    return %c0_i32, %c0_i32_0 : i32, i32
  }
  func.func @transform_6(%arg0: i32) -> (i32, i32) {
    %c0_i32 = arith.constant 0 : i32
    %c0_i32_0 = arith.constant 0 : i32
    %c0_i32_1 = arith.constant 0 : i32
    return %c0_i32, %c0_i32_0 : i32, i32
  }
  func.func @transform_7(%arg0: i32) -> (i32, i32) {
    %c0_i32 = arith.constant 0 : i32
    %c0_i32_0 = arith.constant 0 : i32
    %c0_i32_1 = arith.constant 0 : i32
    return %c0_i32, %c0_i32_0 : i32, i32
  }
  func.func @transform_8(%arg0: i32) -> (i32, i32) {
    %c0_i32 = arith.constant 0 : i32
    %c0_i32_0 = arith.constant 0 : i32
    return %arg0, %c0_i32 : i32, i32
  }
}

</mosaic_0001>

<bundles_post_ra>
// kernel: simple_effective_regressor.1
= control target key start
LH: loop header
LB: loop body
LE: loop exit
PB: predicated region body
PF: predicated region fallthrough
CT: control target
= control target key end

     0   :  { %13 = vsyncpa [#allocation3], 0  ;;  %s1953_s27 = smov [#allocation2]   ;;  %s2162_s0 = inlined_call_operand.vmem [shape: f32[8,1024], index: 0, kind: input, shape index: {}]   ;;  %s2163_s1 = inlined_call_operand.hbm [shape: bf16[1024,256], index: 1, kind: input, shape index: {}]   ;;  %s2164_s2 = inlined_call_operand.vmem [shape: bf16[256,64], index: 2, kind: input, shape index: {}]   ;;  %s2165_s3 = inlined_call_operand.vmem [shape: bf16[64,16], index: 3, kind: input, shape index: {}]   ;;  %s2166_s4 = inlined_call_operand.vmem [shape: bf16[16,64], index: 4, kind: input, shape index: {}]   ;;  %s2167_s5 = inlined_call_operand.vmem [shape: bf16[64,32], index: 5, kind: input, shape index: {}]   ;;  %s2168_s6 = inlined_call_operand.vmem [shape: bf16[32,2], index: 6, kind: input, shape index: {}]   ;;  %s2169_s7 = inlined_call_operand.vmem [shape: f32[8,256], index: 7, kind: input, shape index: {}]   ;;  %s2170_s8 = inlined_call_operand.vmem [shape: f32[8,2], index: 8, kind: output, shape index: {}]  }
   0x1   :  { %s21_s28 = sshll.u32 %s1953_s27, 4  ;;  %s1929_s9 = scalar_lea.hbm %s2163_s1, 16384  ;;  %s22_s28 = int_to_ptr.vmem [resolvable:$true] %s21_s28 }
   0x2   :  { %p1930_p0 = scmp.ne.s32.totalorder %s2163_s1, %s1929_s9  ;;  %p1933_p1 = scmp.lt.u32.totalorder %s1929_s9, %s2163_s1 }
   0x4   :  { %p1935_p2 = pnand %p1933_p1, %p1930_p0 }
   0x6   :  { %1938 = shalt.err (!%p1935_p2)
}
   0x7   :  { %s1939_s14 = scalar_lea.vmem %s22_s28, 16384  ;;  %p1944_p4 = scmp.lt.s32.totalorder %s22_s28, %s22_s28 }
   0x8   :  { %p1940_p3 = scmp.ne.s32.totalorder %s22_s28, %s1939_s14  ;;  %p1945_p5 = scmp.lt.s32.totalorder %s1939_s14, %s1939_s14 }
   0xa   :  { %p1946_p6 = por %p1945_p5, %p1944_p4 }
   0xc   :  { %p1947_p7 = pnand %p1946_p6, %p1940_p3 }
   0xe   :  { %1950 = shalt.err (!%p1947_p7)
}
   0xf   :  { %s1954_s15 = smov 128   ;;  %s1955_s16 = smov 8  }
  0x10   :  { %27 = dma.hbm_to_vmem [thread:$0]  %s2163_s1, 16384, %s22_s28, [#allocation3], %s1954_s15, %s1954_s15, %s1955_s16  }
  0x11   :  { %1951 = dma.done.wait [#allocation3], 16384  }
  0x12   :  { %1952 = vsyncadd [#allocation3], 4294950912  ;;  %v1710_v0 = vld [vmem:[#allocation2 + $0x104] ss:$8 sps:$4 sm:$0xff]   ;;  %v1712_v1 = vld [vmem:[#allocation2 + $0x100] ss:$8 sps:$4 sm:$0xff]  }
  0x13   :  { %881 = vmatprep.subr.bf16.mxu0 %v1710_v0  ;;  %v1713_v2 = vld [vmem:[#allocation2 + $0x114] ss:$8 sps:$4 sm:$0xff]   ;;  %v1715_v3 = vld [vmem:[#allocation2 + $0x110] ss:$8 sps:$4 sm:$0xff]   ;;  %v1716_v4 = vld [vmem:[#allocation2 + $0x124] ss:$8 sps:$4 sm:$0xff]  }
  0x14   :  { %882 = vmatpush1.bf16.msra.mxu0 %v1712_v1  ;;  %v1718_v5 = vld [vmem:[#allocation2 + $0x120] ss:$8 sps:$4 sm:$0xff]   ;;  %v1719_v6 = vld [vmem:[#allocation2 + $0x134] ss:$8 sps:$4 sm:$0xff]   ;;  %v1721_v7 = vld [vmem:[#allocation2 + $0x130] ss:$8 sps:$4 sm:$0xff]  }
  0x15   :  { %883 = vmatprep.subr.bf16.mxu0 %v1713_v2  ;;  %v1722_v8 = vld [vmem:[#allocation2 + $0x144] ss:$8 sps:$4 sm:$0xff]   ;;  %v1724_v9 = vld [vmem:[#allocation2 + $0x140] ss:$8 sps:$4 sm:$0xff]   ;;  %v1725_v10 = vld [vmem:[#allocation2 + $0x154] ss:$8 sps:$4 sm:$0xff]  }
  0x16   :  { %v1727_v11 = vld [vmem:[#allocation2 + $0x150] ss:$8 sps:$4 sm:$0xff]   ;;  %v1728_v12 = vld [vmem:[#allocation2 + $0x164] ss:$8 sps:$4 sm:$0xff]   ;;  %v1730_v15 = vld [vmem:[#allocation2 + $0x160] ss:$8 sps:$4 sm:$0xff]  }
  0x17   :  { %v47_v13 = vld [vmem:[%s2162_s0 + $0x18] sm:$0xff]  ;;  %v1734_v18 = vld [vmem:[#allocation2 + $0x184] ss:$8 sps:$4 sm:$0xff]   ;;  %v1736_v19 = vld [vmem:[#allocation2 + $0x180] ss:$8 sps:$4 sm:$0xff]   ;;  %vm1957_vm0 = vmmov 0  }
  0x18   :  { %884 = vmatpush1.bf16.msra.mxu0 %v1715_v3  ;;  %v56_v14 = vpack.c.bf16 %v47_v13, %v47_v13  ;;  %v1731_v16 = vld [vmem:[#allocation2 + $0x174] ss:$8 sps:$4 sm:$0xff]   ;;  %v1733_v17 = vld [vmem:[#allocation2 + $0x170] ss:$8 sps:$4 sm:$0xff]   ;;  %v1740_v22 = vld [vmem:[#allocation2 + $0x1a4] ss:$8 sps:$4 sm:$0xff]  }
  0x19   :  { %885 = vmatprep.subr.bf16.mxu0 %v1716_v4  ;;  %v1737_v20 = vld [vmem:[#allocation2 + $0x194] ss:$8 sps:$4 sm:$0xff]   ;;  %v1739_v21 = vld [vmem:[#allocation2 + $0x190] ss:$8 sps:$4 sm:$0xff]   ;;  %v1742_v23 = vld [vmem:[#allocation2 + $0x1a0] ss:$8 sps:$4 sm:$0xff]  }
  0x1a   :  { %913 = vmatprep.mubr.bf16.mxu0 %v56_v14  ;;  %v1743_v24 = vld [vmem:[#allocation2 + $0x1b4] ss:$8 sps:$4 sm:$0xff]   ;;  %v1745_v25 = vld [vmem:[#allocation2 + $0x1b0] ss:$8 sps:$4 sm:$0xff]   ;;  %v1803_v26 = vld [vmem:[#allocation2 + $0x4] ss:$8 sps:$4 sm:$0xff]  }
  0x1b   :  { %v1805_v27 = vld [vmem:[#allocation2] ss:$8 sps:$4 sm:$0xff]   ;;  %v1746_v28 = vld [vmem:[#allocation2 + $0x1c4] ss:$8 sps:$4 sm:$0xff]   ;;  %840 = vmatprep.subr.bf16.mxu1 %v1803_v26  ;;  %v1809_v29 = vld [vmem:[#allocation2 + $0x14] ss:$8 sps:$4 sm:$0xff]  }
  0x1c   :  { %886 = vmatpush1.bf16.msra.mxu0 %v1718_v5  ;;  %841 = vmatpush1.bf16.msra.mxu1 %v1805_v27  ;;  %v1811_v30 = vld [vmem:[#allocation2 + $0x10] ss:$8 sps:$4 sm:$0xff]   ;;  %v1748_v31 = vld [vmem:[#allocation2 + $0x1c0] ss:$8 sps:$4 sm:$0xff]   ;;  %v1749_v32 = vld [vmem:[#allocation2 + $0x1d4] ss:$8 sps:$4 sm:$0xff]  }
  0x1d   :  { %887 = vmatprep.subr.bf16.mxu0 %v1719_v6  ;;  %842 = vmatprep.subr.bf16.mxu1 %v1809_v29  ;;  %v1815_v33 = vld [vmem:[#allocation2 + $0x24] ss:$8 sps:$4 sm:$0xff]   ;;  %v1817_v34 = vld [vmem:[#allocation2 + $0x20] ss:$8 sps:$4 sm:$0xff]   ;;  %v1751_v35 = vld [vmem:[#allocation2 + $0x1d0] ss:$8 sps:$4 sm:$0xff]  }
  0x1e   :  { %v1821_v36 = vld [vmem:[#allocation2 + $0x34] ss:$8 sps:$4 sm:$0xff]   ;;  %v1752_v37 = vld [vmem:[#allocation2 + $0x1e4] ss:$8 sps:$4 sm:$0xff]   ;;  %v1823_v38 = vld [vmem:[#allocation2 + $0x30] ss:$8 sps:$4 sm:$0xff]  }
  0x1f   :  { %v1827_v39 = vld [vmem:[#allocation2 + $0x44] ss:$8 sps:$4 sm:$0xff]   ;;  %v1754_v40 = vld [vmem:[#allocation2 + $0x1e0] ss:$8 sps:$4 sm:$0xff]   ;;  %v1755_v41 = vld [vmem:[#allocation2 + $0x1f4] ss:$8 sps:$4 sm:$0xff]  }
  0x20   :  { %888 = vmatpush1.bf16.msra.mxu0 %v1721_v7  ;;  %843 = vmatpush1.bf16.msra.mxu1 %v1811_v30  ;;  %v1829_v42 = vld [vmem:[#allocation2 + $0x40] ss:$8 sps:$4 sm:$0xff]   ;;  %v1757_v43 = vld [vmem:[#allocation2 + $0x1f0] ss:$8 sps:$4 sm:$0xff]   ;;  %v1833_v44 = vld [vmem:[#allocation2 + $0x54] ss:$8 sps:$4 sm:$0xff]  }
  0x21   :  { %889 = vmatprep.subr.bf16.mxu0 %v1722_v8  ;;  %844 = vmatprep.subr.bf16.mxu1 %v1815_v33  ;;  %v1760_v45 = vld [vmem:[#allocation2 + $0x204] ss:$8 sps:$4 sm:$0xff]   ;;  %v46_v46 = vld [vmem:[%s2162_s0 + $0x10] sm:$0xff]  ;;  %v1758_v51 = vld [vmem:[#allocation2 + $0x200] ss:$8 sps:$4 sm:$0xff]   ;;  %vm1212_vm1 = vcmask 523264  }
  0x22   :  { %v49_v47 = vld [vmem:[%s2162_s0 + $0x28] sm:$0xff]  ;;  %v1835_v48 = vld [vmem:[#allocation2 + $0x50] ss:$8 sps:$4 sm:$0xff]   ;;  %v55_v49 = vpack.c.bf16 %v46_v46, %v46_v46  ;;  %v1763_v53 = vld [vmem:[#allocation2 + $0x214] ss:$8 sps:$4 sm:$0xff]   ;;  %vm1267_vm2 = vcmask 130048  }
  0x23   :  { %v1839_v50 = vld [vmem:[#allocation2 + $0x64] ss:$8 sps:$4 sm:$0xff]   ;;  %v58_v52 = vpack.c.bf16 %v49_v47, %v49_v47  ;;  %v1841_v54 = vld [vmem:[#allocation2 + $0x60] ss:$8 sps:$4 sm:$0xff]   ;;  %v1845_v55 = vld [vmem:[#allocation2 + $0x74] ss:$8 sps:$4 sm:$0xff]  }
  0x24   :  { %890 = vmatpush1.bf16.msra.mxu0 %v1724_v9  ;;  %845 = vmatpush1.bf16.msra.mxu1 %v1817_v34  ;;  %v1761_v56 = vld [vmem:[#allocation2 + $0x210] ss:$8 sps:$4 sm:$0xff]   ;;  %v1766_v57 = vld [vmem:[#allocation2 + $0x224] ss:$8 sps:$4 sm:$0xff]   ;;  %v1764_v60 = vld [vmem:[#allocation2 + $0x220] ss:$8 sps:$4 sm:$0xff]  }
  0x25   :  { %891 = vmatprep.subr.bf16.mxu0 %v1725_v10  ;;  %846 = vmatprep.subr.bf16.mxu1 %v1821_v36  ;;  %v1847_v58 = vld [vmem:[#allocation2 + $0x70] ss:$8 sps:$4 sm:$0xff]   ;;  %v1851_v59 = vld [vmem:[#allocation2 + $0x84] ss:$8 sps:$4 sm:$0xff]   ;;  %v1769_v61 = vld [vmem:[#allocation2 + $0x234] ss:$8 sps:$4 sm:$0xff]  }
  0x26   :  { %v1853_v62 = vld [vmem:[#allocation2 + $0x80] ss:$8 sps:$4 sm:$0xff]   ;;  %v1857_v63 = vld [vmem:[#allocation2 + $0x94] ss:$8 sps:$4 sm:$0xff]   ;;  %v1767_v0 = vld [vmem:[#allocation2 + $0x230] ss:$8 sps:$4 sm:$0xff]  }
  0x27   :  { %v1772_v1 = vld [vmem:[#allocation2 + $0x244] ss:$8 sps:$4 sm:$0xff]   ;;  %v1859_v2 = vld [vmem:[#allocation2 + $0x90] ss:$8 sps:$4 sm:$0xff]   ;;  %v1770_v4 = vld [vmem:[#allocation2 + $0x240] ss:$8 sps:$4 sm:$0xff]  }
  0x28   :  { %892 = vmatpush1.bf16.msra.mxu0 %v1727_v11  ;;  %847 = vmatpush1.bf16.msra.mxu1 %v1823_v38  ;;  %v1863_v3 = vld [vmem:[#allocation2 + $0xa4] ss:$8 sps:$4 sm:$0xff]   ;;  %v1775_v5 = vld [vmem:[#allocation2 + $0x254] ss:$8 sps:$4 sm:$0xff]   ;;  %v1865_v6 = vld [vmem:[#allocation2 + $0xa0] ss:$8 sps:$4 sm:$0xff]  }
  0x29   :  { %893 = vmatprep.subr.bf16.mxu0 %v1728_v12  ;;  %848 = vmatprep.subr.bf16.mxu1 %v1827_v39  ;;  %v1869_v7 = vld [vmem:[#allocation2 + $0xb4] ss:$8 sps:$4 sm:$0xff]   ;;  %v1773_v8 = vld [vmem:[#allocation2 + $0x250] ss:$8 sps:$4 sm:$0xff]   ;;  %v1778_v9 = vld [vmem:[#allocation2 + $0x264] ss:$8 sps:$4 sm:$0xff]  }
  0x2a   :  { %v1871_v10 = vld [vmem:[#allocation2 + $0xb0] ss:$8 sps:$4 sm:$0xff]   ;;  %v45_v11 = vld [vmem:[%s2162_s0 + $0x8] sm:$0xff]  ;;  %v1893_v27 = vld [vmem:[#allocation2 + $0xf4] ss:$8 sps:$4 sm:$0xff]   ;;  %vm1408_vm3 = vcmask 261120  }
  0x2b   :  { %v1875_v12 = vld [vmem:[#allocation2 + $0xc4] ss:$8 sps:$4 sm:$0xff]   ;;  %v54_v13 = vpack.c.bf16 %v45_v11, %v45_v11  ;;  %v1776_v14 = vld [vmem:[#allocation2 + $0x260] ss:$8 sps:$4 sm:$0xff]   ;;  %v1791_v36 = vld [vmem:[#allocation2 + $0x2b0] ss:$8 sps:$4 sm:$0xff]  }
  0x2c   :  { %894 = vmatpush1.bf16.msra.mxu0 %v1730_v15  ;;  %849 = vmatpush1.bf16.msra.mxu1 %v1829_v42  ;;  %v1781_v15 = vld [vmem:[#allocation2 + $0x274] ss:$8 sps:$4 sm:$0xff]   ;;  %v1790_v26 = vld [vmem:[#allocation2 + $0x2a4] ss:$8 sps:$4 sm:$0xff]   ;;  %v1866_v11 = vld [vmem:[#allocation2 + $0x390] ss:$8 sps:$4 sm:$0xff]  }
  0x2d   :  { %895 = vmatprep.subr.bf16.mxu0 %v1731_v16  ;;  %850 = vmatprep.subr.bf16.mxu1 %v1833_v44  ;;  %v1877_v16 = vld [vmem:[#allocation2 + $0xc0] ss:$8 sps:$4 sm:$0xff]   ;;  %v1906_v39 = vld [vmem:[%s2164_s2 + $0x50] sm:$0xff]   ;;  %v1909_v46 = vld [vmem:[%s2164_s2 + $0x18] sm:$0xff]   ;;  %vm1452_vm4 = vcmask 15360  }
  0x2e   :  { %872 = vmatprep.mubr.bf16.mxu1 %v54_v13  ;;  %v44_v29 = vld [vmem:[%s2162_s0] sm:$0xff]  ;;  %v1905_v38 = vld [vmem:[%s2164_s2 + $0x8] sm:$0xff]   ;;  %v1907_v42 = vld [vmem:[%s2164_s2 + $0x10] sm:$0xff]  }
  0x2f   :  { %v1902_v30 = vld [vmem:[%s2164_s2 + $0x40] sm:$0xff]   ;;  %v53_v34 = vpack.c.bf16 %v44_v29, %v44_v29  ;;  %v1797_v44 = vld [vmem:[#allocation2 + $0x2d0] ss:$8 sps:$4 sm:$0xff]  }
  0x30   :  { %896 = vmatpush1.bf16.msra.mxu0 %v1733_v17  ;;  %851 = vmatpush1.bf16.msra.mxu1 %v1835_v48  ;;  %v1881_v17 = vld [vmem:[#allocation2 + $0xd4] ss:$8 sps:$4 sm:$0xff]   ;;  %v1903_v33 = vld [vmem:[%s2164_s2] sm:$0xff]  }
  0x31   :  { %897 = vmatprep.subr.bf16.mxu0 %v1734_v18  ;;  %852 = vmatprep.subr.bf16.mxu1 %v1839_v50  ;;  %v1779_v18 = vld [vmem:[#allocation2 + $0x270] ss:$8 sps:$4 sm:$0xff]   ;;  %v1910_v47 = vld [vmem:[%s2164_s2 + $0x60] sm:$0xff]  }
  0x32   :  { %v1800_v48 = vld [vmem:[#allocation2 + $0x2e0] ss:$8 sps:$4 sm:$0xff]   ;;  %v1915_v29 = vld [vmem:[%s2164_s2 + $0x30] sm:$0xff]  }
  0x33   :  { %v1911_v50 = vld [vmem:[%s2164_s2 + $0x20] sm:$0xff]  }
  0x34   :  { %898 = vmatpush1.bf16.msra.mxu0 %v1736_v19  ;;  %853 = vmatpush1.bf16.msra.mxu1 %v1841_v54  ;;  %v1784_v19 = vld [vmem:[#allocation2 + $0x284] ss:$8 sps:$4 sm:$0xff]   ;;  %v51_v54 = vld [vmem:[%s2162_s0 + $0x38] sm:$0xff]  ;;  %v1872_v13 = vld [vmem:[#allocation2 + $0x3a0] ss:$8 sps:$4 sm:$0xff]  }
  0x35   :  { %899 = vmatprep.subr.bf16.mxu0 %v1737_v20  ;;  %854 = vmatprep.subr.bf16.mxu1 %v1845_v55  ;;  %v1883_v20 = vld [vmem:[#allocation2 + $0xd0] ss:$8 sps:$4 sm:$0xff]  }
  0x38   :  { %900 = vmatpush1.bf16.msra.mxu0 %v1739_v21  ;;  %855 = vmatpush1.bf16.msra.mxu1 %v1847_v58  ;;  %v1887_v21 = vld [vmem:[#allocation2 + $0xe4] ss:$8 sps:$4 sm:$0xff]   ;;  %v1820_v58 = vld [vmem:[#allocation2 + $0x314] ss:$8 sps:$4 sm:$0xff]  }
  0x39   :  { %901 = vmatprep.subr.bf16.mxu0 %v1740_v22  ;;  %856 = vmatprep.subr.bf16.mxu1 %v1851_v59  ;;  %v1782_v22 = vld [vmem:[#allocation2 + $0x280] ss:$8 sps:$4 sm:$0xff]   ;;  %v1818_v59 = vld [vmem:[#allocation2 + $0x310] ss:$8 sps:$4 sm:$0xff]  }
  0x3c   :  { %902 = vmatpush1.bf16.msra.mxu0 %v1742_v23  ;;  %857 = vmatpush1.bf16.msra.mxu1 %v1853_v62  ;;  %v1787_v23 = vld [vmem:[#allocation2 + $0x294] ss:$8 sps:$4 sm:$0xff]  }
  0x3d   :  { %903 = vmatprep.subr.bf16.mxu0 %v1743_v24  ;;  %858 = vmatprep.subr.bf16.mxu1 %v1857_v63  ;;  %v1785_v24 = vld [vmem:[#allocation2 + $0x290] ss:$8 sps:$4 sm:$0xff]   ;;  %v1832_v62 = vld [vmem:[#allocation2 + $0x334] ss:$8 sps:$4 sm:$0xff]  }
  0x3e   :  { %v1830_v63 = vld [vmem:[#allocation2 + $0x330] ss:$8 sps:$4 sm:$0xff]  }
  0x40   :  { %904 = vmatpush1.bf16.msra.mxu0 %v1745_v25  ;;  %859 = vmatpush1.bf16.msra.mxu1 %v1859_v2  ;;  %v1889_v25 = vld [vmem:[#allocation2 + $0xe0] ss:$8 sps:$4 sm:$0xff]   ;;  %v1844_v2 = vld [vmem:[#allocation2 + $0x354] ss:$8 sps:$4 sm:$0xff]  }
  0x41   :  { %905 = vmatprep.subr.bf16.mxu0 %v1746_v28  ;;  %860 = vmatprep.subr.bf16.mxu1 %v1863_v3  ;;  %v1895_v28 = vld [vmem:[#allocation2 + $0xf0] ss:$8 sps:$4 sm:$0xff]  }
  0x42   :  { %v1842_v3 = vld [vmem:[#allocation2 + $0x350] ss:$8 sps:$4 sm:$0xff]  }
  0x44   :  { %906 = vmatpush1.bf16.msra.mxu0 %v1748_v31  ;;  %861 = vmatpush1.bf16.msra.mxu1 %v1865_v6  ;;  %v1788_v31 = vld [vmem:[#allocation2 + $0x2a0] ss:$8 sps:$4 sm:$0xff]   ;;  %v1856_v6 = vld [vmem:[#allocation2 + $0x374] ss:$8 sps:$4 sm:$0xff]  }
  0x45   :  { %907 = vmatprep.subr.bf16.mxu0 %v1749_v32  ;;  %862 = vmatprep.subr.bf16.mxu1 %v1869_v7  ;;  %v1793_v32 = vld [vmem:[#allocation2 + $0x2b4] ss:$8 sps:$4 sm:$0xff]   ;;  %v1854_v7 = vld [vmem:[#allocation2 + $0x370] ss:$8 sps:$4 sm:$0xff]  }
  0x48   :  { %908 = vmatpush1.bf16.msra.mxu0 %v1751_v35  ;;  %863 = vmatpush1.bf16.msra.mxu1 %v1871_v10  ;;  %v1904_v35 = vld [vmem:[%s2164_s2 + $0x48] sm:$0xff]   ;;  %v1868_v10 = vld [vmem:[#allocation2 + $0x394] ss:$8 sps:$4 sm:$0xff]  }
  0x49   :  { %909 = vmatprep.subr.bf16.mxu0 %v1752_v37  ;;  %864 = vmatprep.subr.bf16.mxu1 %v1875_v12  ;;  %v1796_v37 = vld [vmem:[#allocation2 + $0x2c4] ss:$8 sps:$4 sm:$0xff]  }
  0x4a   :  { %v1874_v12 = vld [vmem:[#allocation2 + $0x3a4] ss:$8 sps:$4 sm:$0xff]  }
  0x4c   :  { %910 = vmatpush1.bf16.msra.mxu0 %v1754_v40  ;;  %865 = vmatpush1.bf16.msra.mxu1 %v1877_v16  ;;  %v1794_v40 = vld [vmem:[#allocation2 + $0x2c0] ss:$8 sps:$4 sm:$0xff]   ;;  %v1886_v16 = vld [vmem:[#allocation2 + $0x3c4] ss:$8 sps:$4 sm:$0xff]  }
  0x4d   :  { %911 = vmatprep.subr.bf16.mxu0 %v1755_v41  ;;  %866 = vmatprep.subr.bf16.mxu1 %v1881_v17  ;;  %v1799_v41 = vld [vmem:[#allocation2 + $0x2d4] ss:$8 sps:$4 sm:$0xff]   ;;  %v1884_v17 = vld [vmem:[#allocation2 + $0x3c0] ss:$8 sps:$4 sm:$0xff]  }
  0x50   :  { %912 = vmatpush1.bf16.msra.mxu0 %v1757_v43  ;;  %867 = vmatpush1.bf16.msra.mxu1 %v1883_v20  ;;  %v1908_v43 = vld [vmem:[%s2164_s2 + $0x58] sm:$0xff]   ;;  %v1898_v20 = vld [vmem:[#allocation2 + $0x3e4] ss:$8 sps:$4 sm:$0xff]  }
  0x51   :  { %922 = vmatprep.subr.bf16.mxu0 %v1760_v45  ;;  %868 = vmatprep.subr.bf16.mxu1 %v1887_v21  ;;  %v1802_v45 = vld [vmem:[#allocation2 + $0x2e4] ss:$8 sps:$4 sm:$0xff]   ;;  %v1896_v21 = vld [vmem:[#allocation2 + $0x3e0] ss:$8 sps:$4 sm:$0xff]  }
  0x53   :  { %914 = vmatmul.mubr.bf16.vlgmr.msra.gmra.mrb[0].mxu0 %v55_v49  ;;  %v1808_v49 = vld [vmem:[#allocation2 + $0x2f4] ss:$8 sps:$4 sm:$0xff]  }
  0x54   :  { %923 = vmatpush1.bf16.msra.mxu0 %v1758_v51  ;;  %954 = vmatprep.mubr.bf16.mxu0 %v58_v52  ;;  %v1806_v51 = vld [vmem:[#allocation2 + $0x2f0] ss:$8 sps:$4 sm:$0xff]   ;;  %v48_v52 = vld [vmem:[%s2162_s0 + $0x20] sm:$0xff] }
  0x55   :  { %924 = vmatprep.subr.bf16.mxu0 %v1763_v53  ;;  %869 = vmatpush1.bf16.msra.mxu1 %v1889_v25  ;;  %v1814_v53 = vld [vmem:[#allocation2 + $0x304] ss:$8 sps:$4 sm:$0xff]   ;;  %v57_v55 = vpack.c.bf16 %v48_v52, %v48_v52 }
  0x56   :  { %870 = vmatprep.subr.bf16.mxu1 %v1893_v27  ;;  %v1913_v27 = vld [vmem:[%s2164_s2 + $0x28] sm:$0xff]  }
  0x58   :  { %925 = vmatpush1.bf16.msra.mxu0 %v1761_v56  ;;  %v1812_v56 = vld [vmem:[#allocation2 + $0x300] ss:$8 sps:$4 sm:$0xff]  }
  0x59   :  { %926 = vmatprep.subr.bf16.mxu0 %v1766_v57  ;;  %871 = vmatpush1.bf16.msra.mxu1 %v1895_v28  ;;  %v60_v57 = vpack.c.bf16 %v51_v54, %v51_v54  ;;  %v1914_v28 = vld [vmem:[%s2164_s2 + $0x70] sm:$0xff]  }
  0x5a   :  { %1618 = vmatprep.subr.bf16.mxu1 %v1902_v30  ;;  %v1916_v30 = vld [vmem:[%s2164_s2 + $0x78] sm:$0xff]  }
  0x5c   :  { %927 = vmatpush1.bf16.msra.mxu0 %v1764_v60  ;;  %873 = vmatmul.mubr.bf16.vlgmr.msra.gmra.mrb[0].mxu1 %v53_v34  ;;  %v1826_v60 = vld [vmem:[#allocation2 + $0x324] ss:$8 sps:$4 sm:$0xff]  }
  0x5d   :  { %928 = vmatprep.subr.bf16.mxu0 %v1769_v61  ;;  %1619 = vmatpush3.bf16.msra.mxu1 %v1903_v33  ;;  %v1824_v61 = vld [vmem:[#allocation2 + $0x320] ss:$8 sps:$4 sm:$0xff]  }
  0x5e   :  { %1620 = vmatprep.subr.bf16.mxu1 %v1904_v35 }
  0x60   :  { %929 = vmatpush1.bf16.msra.mxu0 %v1767_v0  ;;  %v1838_v0 = vld [vmem:[#allocation2 + $0x344] ss:$8 sps:$4 sm:$0xff]  }
  0x61   :  { %930 = vmatprep.subr.bf16.mxu0 %v1772_v1  ;;  %1621 = vmatpush3.bf16.msra.mxu1 %v1905_v38  ;;  %v1836_v1 = vld [vmem:[#allocation2 + $0x340] ss:$8 sps:$4 sm:$0xff]  }
  0x62   :  { %1622 = vmatprep.subr.bf16.mxu1 %v1906_v39 }
  0x64   :  { %931 = vmatpush1.bf16.msra.mxu0 %v1770_v4  ;;  %v1850_v4 = vld [vmem:[#allocation2 + $0x364] ss:$8 sps:$4 sm:$0xff]  }
  0x65   :  { %932 = vmatprep.subr.bf16.mxu0 %v1775_v5  ;;  %1623 = vmatpush3.bf16.msra.mxu1 %v1907_v42  ;;  %v1848_v5 = vld [vmem:[#allocation2 + $0x360] ss:$8 sps:$4 sm:$0xff]  }
  0x66   :  { %1624 = vmatprep.subr.bf16.mxu1 %v1908_v43 }
  0x68   :  { %933 = vmatpush1.bf16.msra.mxu0 %v1773_v8  ;;  %v1862_v8 = vld [vmem:[#allocation2 + $0x384] ss:$8 sps:$4 sm:$0xff]  }
  0x69   :  { %934 = vmatprep.subr.bf16.mxu0 %v1778_v9  ;;  %1625 = vmatpush3.bf16.msra.mxu1 %v1909_v46  ;;  %v1860_v9 = vld [vmem:[#allocation2 + $0x380] ss:$8 sps:$4 sm:$0xff]  }
  0x6a   :  { %1626 = vmatprep.subr.bf16.mxu1 %v1910_v47 }
  0x6c   :  { %935 = vmatpush1.bf16.msra.mxu0 %v1776_v14  ;;  %v1880_v14 = vld [vmem:[#allocation2 + $0x3b4] ss:$8 sps:$4 sm:$0xff]  }
  0x6d   :  { %936 = vmatprep.subr.bf16.mxu0 %v1781_v15  ;;  %1627 = vmatpush3.bf16.msra.mxu1 %v1911_v50  ;;  %v1878_v15 = vld [vmem:[#allocation2 + $0x3b0] ss:$8 sps:$4 sm:$0xff]  }
  0x70   :  { %937 = vmatpush1.bf16.msra.mxu0 %v1779_v18  ;;  %v1892_v18 = vld [vmem:[#allocation2 + $0x3d4] ss:$8 sps:$4 sm:$0xff]  }
  0x71   :  { %938 = vmatprep.subr.bf16.mxu0 %v1784_v19  ;;  %v1890_v19 = vld [vmem:[#allocation2 + $0x3d0] ss:$8 sps:$4 sm:$0xff]  }
  0x74   :  { %939 = vmatpush1.bf16.msra.mxu0 %v1782_v22  ;;  %v1901_v22 = vld [vmem:[#allocation2 + $0x3f4] ss:$8 sps:$4 sm:$0xff]  }
  0x75   :  { %940 = vmatprep.subr.bf16.mxu0 %v1787_v23  ;;  %v1899_v23 = vld [vmem:[#allocation2 + $0x3f0] ss:$8 sps:$4 sm:$0xff]  }
  0x78   :  { %941 = vmatpush1.bf16.msra.mxu0 %v1785_v24  ;;  %v50_v24 = vld [vmem:[%s2162_s0 + $0x30] sm:$0xff] }
  0x79   :  { %942 = vmatprep.subr.bf16.mxu0 %v1790_v26  ;;  %v59_v25 = vpack.c.bf16 %v50_v24, %v50_v24  ;;  %v1912_v26 = vld [vmem:[%s2164_s2 + $0x68] sm:$0xff]  }
  0x7a   :  { %1628 = vmatprep.subr.bf16.mxu1 %v1912_v26 }
  0x7b   :  { %1629 = vmatpush3.bf16.msra.mxu1 %v1913_v27  ;;  %v1928_v27 = vld [vmem:[%s2168_s6 + $0x8] sm:$0xff]  }
  0x7c   :  { %943 = vmatpush1.bf16.msra.mxu0 %v1788_v31  ;;  %1630 = vmatprep.subr.bf16.mxu1 %v1914_v28  ;;  %v1917_v31 = vld [vmem:[%s2164_s2 + $0x38] sm:$0xff]   ;;  %v1312_v28 = vld [vmem:[%s2169_s7 + $0x4] ss:$0 sm:$0xff] }
  0x7d   :  { %944 = vmatprep.subr.bf16.mxu0 %v1793_v32  ;;  %v1956_v32 = vmov 0.0  }
  0x7f   :  { %1631 = vmatpush3.bf16.msra.mxu1 %v1915_v29 }
  0x80   :  { %945 = vmatpush1.bf16.msra.mxu0 %v1791_v36  ;;  %1632 = vmatprep.subr.bf16.mxu1 %v1916_v30 }
  0x81   :  { %946 = vmatprep.subr.bf16.mxu0 %v1796_v37  ;;  %v190_v37 = vlaneseq }
  0x83   :  { %1633 = vmatpush3.bf16.msra.mxu1 %v1917_v31  ;;  %v191_v38 = vshrl.u32 %v190_v37, 7 }
  0x84   :  { %947 = vmatpush1.bf16.msra.mxu0 %v1794_v40  ;;  %1655 = vmatprep.subr.bf16.mxu1 %v1956_v32  ;;  %v52_v40 = vld [vmem:[%s2169_s7] ss:$8 sm:$0x3] }
  0x85   :  { %948 = vmatprep.subr.bf16.mxu0 %v1799_v41  ;;  %v192_v39 = vsub.s32 0, %v191_v38  ;;  %v196_v41 = vsub.s32 1, %v191_v38 }
  0x87   :  { %v193_v42 = vrot.slane %v52_v40, %v192_v39  ;;  %v197_v43 = vrot.slane %v52_v40, %v196_v41 }
  0x88   :  { %949 = vmatpush1.bf16.msra.mxu0 %v1797_v44 }
  0x89   :  { %950 = vmatprep.subr.bf16.mxu0 %v1802_v45 }
  0x8c   :  { %951 = vmatpush1.bf16.msra.mxu0 %v1800_v48 }
  0x8d   :  { %952 = vmatprep.subr.bf16.mxu0 %v1808_v49 }
  0x90   :  { %953 = vmatpush1.bf16.msra.mxu0 %v1806_v51 }
  0x91   :  { %963 = vmatprep.subr.bf16.mxu0 %v1814_v53 }
  0x93   :  { %955 = vmatmul.mubr.bf16.vlgmr.msra.gmra.mrb[0].mxu0 %v57_v55  ;;  %v1918_v55 = vld [vmem:[%s2165_s3] sm:$0xff]  }
  0x94   :  { %964 = vmatpush1.bf16.msra.mxu0 %v1812_v56  ;;  %995 = vmatprep.mubr.bf16.mxu0 %v60_v57  ;;  %v1919_v57 = vld [vmem:[%s2165_s3 + $0x8] sm:$0xff]  }
  0x95   :  { %965 = vmatprep.subr.bf16.mxu0 %v1820_v58  ;;  %v1920_v58 = vld [vmem:[%s2165_s3 + $0x10] sm:$0xff]  }
  0x98   :  { %966 = vmatpush1.bf16.msra.mxu0 %v1818_v59  ;;  %v1921_v59 = vld [vmem:[%s2165_s3 + $0x18] sm:$0xff]  }
  0x99   :  { %967 = vmatprep.subr.bf16.mxu0 %v1826_v60 }
  0x9c   :  { %968 = vmatpush1.bf16.msra.mxu0 %v1824_v61  ;;  %v1006_v61 = vld [vmem:[%s2169_s7 + $0x1] ss:$0 sm:$0xff] }
  0x9d   :  { %969 = vmatprep.subr.bf16.mxu0 %v1832_v62 }
  0xa0   :  { %970 = vmatpush1.bf16.msra.mxu0 %v1830_v63 }
  0xa1   :  { %971 = vmatprep.subr.bf16.mxu0 %v1838_v0 }
  0xa4   :  { %972 = vmatpush1.bf16.msra.mxu0 %v1836_v1 }
  0xa5   :  { %973 = vmatprep.subr.bf16.mxu0 %v1844_v2 }
  0xa8   :  { %974 = vmatpush1.bf16.msra.mxu0 %v1842_v3 }
  0xa9   :  { %975 = vmatprep.subr.bf16.mxu0 %v1850_v4  ;;  %v1922_v4 = vld [vmem:[%s2166_s4] sm:$0xff]  }
  0xac   :  { %976 = vmatpush1.bf16.msra.mxu0 %v1848_v5 }
  0xad   :  { %977 = vmatprep.subr.bf16.mxu0 %v1856_v6  ;;  %v1178_v6 = vld [vmem:[%s2169_s7 + $0x2] ss:$0 sm:$0xff] }
  0xb0   :  { %978 = vmatpush1.bf16.msra.mxu0 %v1854_v7 }
  0xb1   :  { %979 = vmatprep.subr.bf16.mxu0 %v1862_v8 }
  0xb4   :  { %980 = vmatpush1.bf16.msra.mxu0 %v1860_v9 }
  0xb5   :  { %981 = vmatprep.subr.bf16.mxu0 %v1868_v10 }
  0xb8   :  { %982 = vmatpush1.bf16.msra.mxu0 %v1866_v11 }
  0xb9   :  { %983 = vmatprep.subr.bf16.mxu0 %v1874_v12 }
  0xbc   :  { %984 = vmatpush1.bf16.msra.mxu0 %v1872_v13  ;;  %v1923_v13 = vld [vmem:[%s2167_s5] sm:$0xff]  }
  0xbd   :  { %985 = vmatprep.subr.bf16.mxu0 %v1880_v14 }
  0xc0   :  { %986 = vmatpush1.bf16.msra.mxu0 %v1878_v15  ;;  %v1924_v15 = vld [vmem:[%s2167_s5 + $0x8] sm:$0xff]  }
  0xc1   :  { %987 = vmatprep.subr.bf16.mxu0 %v1886_v16  ;;  %v1925_v16 = vld [vmem:[%s2167_s5 + $0x10] sm:$0xff]  }
  0xc4   :  { %988 = vmatpush1.bf16.msra.mxu0 %v1884_v17  ;;  %v1926_v17 = vld [vmem:[%s2167_s5 + $0x18] sm:$0xff]  }
  0xc5   :  { %989 = vmatprep.subr.bf16.mxu0 %v1892_v18  ;;  %v1257_v18 = vld [vmem:[%s2169_s7 + $0x3] ss:$0 sm:$0xff] }
  0xc8   :  { %990 = vmatpush1.bf16.msra.mxu0 %v1890_v19 }
  0xc9   :  { %991 = vmatprep.subr.bf16.mxu0 %v1898_v20 }
  0xcc   :  { %992 = vmatpush1.bf16.msra.mxu0 %v1896_v21 }
  0xcd   :  { %993 = vmatprep.subr.bf16.mxu0 %v1901_v22 }
  0xd0   :  { %994 = vmatpush1.bf16.msra.mxu0 %v1899_v23 }
  0xd3   :  { %996 = vmatmul.mubr.bf16.vlgmr.msra.gmra.mrb[0].mxu0 %v59_v25  ;;  %v1927_v25 = vld [vmem:[%s2168_s6] sm:$0xff]  }
 0x12f   :  { %v874_v33 = vpop.f32.mrb[0].mxu1 }
 0x130   :  { %v876_v34 = vpop.f32.mrb[1].mxu1  ;;  %v875_v44 = vadd.f32 %v874_v33, %v193_v42 }
 0x131   :  { %v878_v35 = vpop.f32.mrb[2].mxu1  ;;  %v877_v45 = vadd.f32 %v876_v34, %v197_v43 }
 0x132   :  { %v879_v36 = vpop.f32.mrb[3].mxu1 }
 0x1a6   :  { %v997_v46 = vpop.f32.mrb[0].mxu0 }
 0x1a7   :  { %v1694_v47 = vadd.f32 %v997_v46, %v875_v44  ;;  %v999_v48 = vpop.f32.mrb[1].mxu0 }
 0x1a8   :  { %v1696_v49 = vadd.f32 %v999_v48, %v877_v45  ;;  %v1001_v50 = vpop.f32.mrb[2].mxu0 }
 0x1a9   :  { %v1004_v51 = vmax.f32 %v1694_v47, 0.0  ;;  %v1002_v52 = vpop.f32.mrb[3].mxu0 }
 0x1aa   :  { %v1005_v53 = vmax.f32 %v1696_v49, 0.0 }
 0x1ab   :  { %v1007_v56 = vpack.c.bf16 %v1004_v51, %v1004_v51 }
 0x1ac   :  { %v1008_v54 = vpack.c.bf16 %v1005_v53, %v1005_v53 }
 0x1ae   :  { %1169 = vmatprep.mubr.bf16.mxu1 %v1008_v54 }
 0x1af   :  { %1170 = vmatmul.mubr.bf16.vlgmr.msra.gmra.mrb[4].mxu1 %v1007_v56 }
 0x1b0   :  { %1656 = vmatpush3.bf16.msra.mxu1 %v1918_v55  ;;  %1663 = vmatprep.mubr.msk.bf16.mxu1 %vm1957_vm0, %v1956_v32 }
 0x1b1   :  { %1657 = vmatprep.subr.bf16.mxu1 %v1956_v32 }
 0x1b4   :  { %1658 = vmatpush3.bf16.msra.mxu1 %v1919_v57 }
 0x1b5   :  { %1659 = vmatprep.subr.bf16.mxu1 %v1956_v32 }
 0x1b8   :  { %1660 = vmatpush3.bf16.msra.mxu1 %v1920_v58 }
 0x1b9   :  { %1661 = vmatprep.subr.bf16.mxu1 %v1956_v32 }
 0x1bc   :  { %1662 = vmatpush3.bf16.msra.mxu1 %v1921_v59 }
 0x1bd   :  { %1667 = vmatprep.subr.bf16.mxu1 %v1956_v32 }
 0x282   :  { %v1634_v60 = vpop.f32.mrb[4].mxu1 }
 0x283   :  { %v1635_v62 = vpop.f32.mrb[5].mxu1 }
 0x284   :  { %v1636_v63 = vadd.f32 %v1635_v62, %v1634_v60  ;;  %v1637_v0 = vpop.f32.mrb[6].mxu1 }
 0x285   :  { %v1638_v1 = vpop.f32.mrb[7].mxu1 }
 0x286   :  { %v1172_v2 = vadd.f32 %v1636_v63, %v1006_v61 }
 0x288   :  { %v1177_v3 = vmax.f32 %v1172_v2, 0.0 }
 0x28a   :  { %v1179_v5 = vpack.c.bf16 %v1177_v3, %v1177_v3 }
 0x28c   :  { %1664 = vmatmul.mubr.msk.bf16.vlgmr.msra.gmra.mrb[8].mxu1 %vm1212_vm1, %v1179_v5 }
 0x28d   :  { %1668 = vmatpush3.bf16.msra.mxu1 %v1922_v4  ;;  %1669 = vmatprep.mubr.msk.bf16.mxu1 %vm1957_vm0, %v1956_v32 }
 0x28e   :  { %1673 = vmatprep.subr.bf16.mxu1 %v1956_v32 }
 0x35f   :  { %v1250_v7 = vpop.f32.mrb[8].mxu1 }
 0x360   :  { %v1251_v8 = vadd.f32 %v1250_v7, %v1178_v6  ;;  %v1665_v9 = vpop.f32.mrb[9].mxu1 }
 0x361   :  { %v1253_v10 = vpop.f32.mrb[10].mxu1 }
 0x362   :  { %v1256_v11 = vmax.f32 %v1251_v8, 0.0  ;;  %v1666_v12 = vpop.f32.mrb[11].mxu1 }
 0x364   :  { %v1258_v14 = vpack.c.bf16 %v1256_v11, %v1256_v11 }
 0x366   :  { %1670 = vmatmul.mubr.msk.bf16.vlgmr.msra.gmra.mrb[12].mxu1 %vm1267_vm2, %v1258_v14 }
 0x367   :  { %1674 = vmatpush3.bf16.msra.mxu1 %v1923_v13  ;;  %1681 = vmatprep.mubr.msk.bf16.mxu1 %vm1957_vm0, %v1956_v32 }
 0x368   :  { %1675 = vmatprep.subr.bf16.mxu1 %v1956_v32 }
 0x36b   :  { %1676 = vmatpush3.bf16.msra.mxu1 %v1924_v15 }
 0x36c   :  { %1677 = vmatprep.subr.bf16.mxu1 %v1956_v32 }
 0x36f   :  { %1678 = vmatpush3.bf16.msra.mxu1 %v1925_v16 }
 0x370   :  { %1679 = vmatprep.subr.bf16.mxu1 %v1956_v32 }
 0x373   :  { %1680 = vmatpush3.bf16.msra.mxu1 %v1926_v17 }
 0x374   :  { %1685 = vmatprep.subr.bf16.mxu1 %v1956_v32 }
 0x439   :  { %v1305_v19 = vpop.f32.mrb[12].mxu1 }
 0x43a   :  { %v1306_v20 = vadd.f32 %v1305_v19, %v1257_v18  ;;  %v1671_v21 = vpop.f32.mrb[13].mxu1 }
 0x43b   :  { %v1308_v22 = vpop.f32.mrb[14].mxu1 }
 0x43c   :  { %v1311_v23 = vmax.f32 %v1306_v20, 0.0  ;;  %v1672_v24 = vpop.f32.mrb[15].mxu1 }
 0x43e   :  { %v1313_v26 = vpack.c.bf16 %v1311_v23, %v1311_v23 }
 0x440   :  { %1682 = vmatmul.mubr.msk.bf16.vlgmr.msra.gmra.mrb[16].mxu1 %vm1212_vm1, %v1313_v26 }
 0x441   :  { %1686 = vmatpush3.bf16.msra.mxu1 %v1927_v25  ;;  %1689 = vmatprep.mubr.msk.bf16.mxu1 %vm1957_vm0, %v1956_v32 }
 0x442   :  { %1687 = vmatprep.subr.bf16.mxu1 %v1956_v32  ;;  %v1390_v32 = vld [vmem:[%s2169_s7 + $0x5] ss:$0 sm:$0xff] }
 0x445   :  { %1688 = vmatpush3.bf16.msra.mxu1 %v1928_v27 }
 0x513   :  { %v1383_v29 = vpop.f32.mrb[16].mxu1 }
 0x514   :  { %v1384_v30 = vadd.f32 %v1383_v29, %v1312_v28  ;;  %v1683_v31 = vpop.f32.mrb[17].mxu1 }
 0x515   :  { %v1386_v33 = vpop.f32.mrb[18].mxu1 }
 0x516   :  { %v1389_v34 = vmax.f32 %v1384_v30, 0.0  ;;  %v1684_v35 = vpop.f32.mrb[19].mxu1 }
 0x518   :  { %v1391_v36 = vpack.c.bf16 %v1389_v34, %v1389_v34 }
 0x51a   :  { %1690 = vmatmul.mubr.msk.bf16.vlgmr.msra.gmra.mrb[20].mxu1 %vm1408_vm3, %v1391_v36 }
 0x5ed   :  { %v1446_v37 = vpop.f32.mrb[20].mxu1 }
 0x5ee   :  { %v1447_v38 = vadd.f32 %v1446_v37, %v1390_v32  ;;  %v1691_v39 = vpop.f32.mrb[21].mxu1 }
 0x5ef   :  { %v1449_v40 = vpop.f32.mrb[22].mxu1 }
 0x5f0   :  { %1453 = vst.msk [vmem:[%s2170_s8] sm:$0xff] %vm1452_vm4, %v1447_v38  ;;  %v1692_v41 = vpop.f32.mrb[23].mxu1 }
 0x5f1   :  { %1458 = vsyncpa [#allocation3], 1 }

</bundles_post_ra>
